<compile_context>
chip_gen: v5e
topology: v5e:2x2
jax: 0.10.0
libtpu: 0.0.40
codegen_flags: <defaults>
</compile_context>

<pallas_src>
import functools

import jax
import jax.numpy as jnp
from jax import lax
from jax.experimental import pallas as pl
from jax.experimental.pallas import tpu as pltpu


# Per-block fused parameters, in the order they are passed to the kernel.
_PARAM_NAMES = (
    "ln1_w", "ln1_b",
    "wqkvg", "bg", "wo", "bo",
    "ln2_w", "ln2_b",
    "w1", "b1", "w2", "b2",
    "gamma2",
)


def _stack_kernel(*refs, no_heads, nb, eps, with_dropout, inv_keep):
    """One grid step = (batch element b, block l); activation carried in VMEM scratch."""
    if with_dropout:
        s_ref, m1_ref, m2_ref = refs[0], refs[1], refs[2]
        params = refs[3:-2]
    else:
        s_ref = refs[0]
        m1_ref = m2_ref = None
        params = refs[1:-2]
    o_ref = refs[-2]
    act_ref = refs[-1]

    (ln1_w, ln1_b, wqkvg, bg, wo, bo,
     ln2_w, ln2_b, w1, b1, w2, b2, gamma2) = params

    blk = pl.program_id(1)

    # Load the activation into the carried f32 scratch at the first block of this batch elem.
    @pl.when(blk == 0)
    def _():
        act_ref[...] = s_ref[0].astype(jnp.float32)

    x = act_ref[...]                       # (N, C) f32
    n_res, c_s = x.shape
    dm = bg.shape[-1]
    dh = dm // no_heads

    def layer_norm(t, w_ref, b_ref):
        mu = jnp.mean(t, axis=-1, keepdims=True)
        var = jnp.mean(jnp.square(t - mu), axis=-1, keepdims=True)
        return (t - mu) * lax.rsqrt(var + eps) * w_ref[0] + b_ref[0]

    # ---------------- attention sub-layer ----------------
    # 1/sqrt(dh) is folded into wq, gamma1 is folded into wo/bo (host-side transforms).
    s1 = layer_norm(x, ln1_w, ln1_b).astype(jnp.bfloat16)
    # Single lane-dense fused projection: (N, C) @ (C, 4*dm) = [q | k | v | gate_logits].
    qkvg = jnp.dot(s1, wqkvg[0], preferred_element_type=jnp.float32)     # (N, 4*dm) f32
    g = jax.nn.sigmoid(qkvg[:, 3 * dm:4 * dm] + bg[0])                    # (N, dm) f32

    ctx_heads = []
    for h in range(no_heads):              # static loop; fine for small head counts
        lo = h * dh
        qh = qkvg[:, 0 * dm + lo:0 * dm + lo + dh].astype(jnp.bfloat16)   # (N, dh)
        kh = qkvg[:, 1 * dm + lo:1 * dm + lo + dh].astype(jnp.bfloat16)
        vh = qkvg[:, 2 * dm + lo:2 * dm + lo + dh].astype(jnp.bfloat16)

        logits = lax.dot_general(qh, kh, (((1,), (1,)), ((), ())),
                                 preferred_element_type=jnp.float32)      # (N, N) f32
        logits = logits - jnp.max(logits, axis=-1, keepdims=True)
        e = jnp.exp(logits)
        probs = e * pl.reciprocal(jnp.sum(e, axis=-1, keepdims=True), approx=True)
        ctx_heads.append(jnp.dot(probs.astype(jnp.bfloat16), vh,
                                 preferred_element_type=jnp.float32))      # (N, dh)

    ctx = jnp.concatenate(ctx_heads, axis=-1) * g                          # (N, dm) f32, gated
    # Single lane-dense output projection (gamma1 already folded into wo/bo).
    attn = jnp.dot(ctx.astype(jnp.bfloat16), wo[0],
                   preferred_element_type=jnp.float32) + bo[0]             # (N, C) f32

    if with_dropout:
        attn = attn * (m1_ref[0, 0].astype(jnp.float32) * inv_keep)
    s2 = x + attn

    # ---------------- MLP sub-layer ----------------
    y = layer_norm(s2, ln2_w, ln2_b).astype(jnp.bfloat16)
    h1 = jnp.maximum(jnp.dot(y, w1[0], preferred_element_type=jnp.float32) + b1[0], 0.0)
    h2 = jnp.maximum(jnp.dot(h1.astype(jnp.bfloat16), w2[0],
                             preferred_element_type=jnp.float32) + b2[0], 0.0)
    d2 = gamma2[0] * h2
    if with_dropout:
        d2 = d2 * (m2_ref[0, 0].astype(jnp.float32) * inv_keep)

    new_s = s2 + d2
    act_ref[...] = new_s                   # carry to next block

    @pl.when(blk == nb - 1)
    def _():
        o_ref[0] = new_s.astype(o_ref.dtype)


def _block_param_spec(shape):
    """BlockSpec selecting one block's weight slab along the stacked leading axis."""
    rest = tuple(shape[1:])
    zeros = (0,) * len(rest)
    return pl.BlockSpec((1,) + rest, lambda b, l, _z=zeros: (l,) + _z)


def _fuse_block_params(p, no_heads):
    """Host-side one-time parameter transform: fuse QKVG, fold scale & gamma1, cast to bf16."""
    dm = p["wq"].shape[1]
    dh = dm // no_heads
    scale = 1.0 / (float(dh) ** 0.5)
    wqkvg = jnp.concatenate([p["wq"] * scale, p["wk"], p["wv"], p["wg"]], axis=1)
    gamma1 = p["gamma1"]                                   # (1, C)
    return dict(
        ln1_w=p["ln1_w"], ln1_b=p["ln1_b"],
        wqkvg=wqkvg.astype(jnp.bfloat16),                  # (C, 4*dm)
        bg=p["bg"],                                        # (1, dm)
        wo=(p["wo"] * gamma1).astype(jnp.bfloat16),        # (dm, C), gamma1 folded
        bo=p["bo"] * gamma1,                               # (1, C),  gamma1 folded
        ln2_w=p["ln2_w"], ln2_b=p["ln2_b"],
        w1=p["w1"].astype(jnp.bfloat16), b1=p["b1"],
        w2=p["w2"].astype(jnp.bfloat16), b2=p["b2"],
        gamma2=p["gamma2"],
    )


def decoy_seq_stack_forward(s, block_params_list, *, no_heads, eps=1e-5,
                            dropout_rate=0.0, training=False, rng=None):
    """Pallas forward of DecoySeqStack: the whole stack in one pallas_call.  s: (B, N, c_s)."""
    B, N, C = s.shape
    nb = len(block_params_list)
    dm = block_params_list[0]["wq"].shape[1]
    with_dropout = bool(training) and float(dropout_rate) > 0.0
    if with_dropout and rng is None:
        raise ValueError("training with dropout requires an rng key")

    fused = [_fuse_block_params(p, no_heads) for p in block_params_list]
    stacked = {k: jnp.stack([fp[k] for fp in fused], axis=0) for k in _PARAM_NAMES}

    act_spec = pl.BlockSpec((1, N, C), lambda b, l: (b, 0, 0))

    inputs = [s]
    in_specs = [act_spec]
    inv_keep = 1.0
    if with_dropout:
        keep = 1.0 - float(dropout_rate)
        inv_keep = 1.0 / keep
        k1, k2 = jax.random.split(rng)
        # int8 keep-masks (4x less HBM traffic than f32); 1/keep applied in f32 in-kernel.
        m1 = jax.random.bernoulli(k1, keep, (nb, B, N, C)).astype(jnp.int8)
        m2 = jax.random.bernoulli(k2, keep, (nb, B, N, C)).astype(jnp.int8)
        mask_spec = pl.BlockSpec((1, 1, N, C), lambda b, l: (l, b, 0, 0))
        inputs += [m1, m2]
        in_specs += [mask_spec, mask_spec]

    for name in _PARAM_NAMES:
        arr = stacked[name]
        inputs.append(arr)
        in_specs.append(_block_param_spec(arr.shape))

    # Explicit VMEM budget: per-block weight slab (double-buffered across the block axis),
    # activation blocks, masks, carried scratch, and in-kernel f32 intermediates.
    wbytes = sum((stacked[k].size // nb) * stacked[k].dtype.itemsize for k in _PARAM_NAMES)
    act_bytes = N * C * s.dtype.itemsize
    mask_bytes = (2 * N * C) if with_dropout else 0
    inter_bytes = N * (4 * dm + 3 * dm + 4 * C + 2 * C) * 4 + 2 * N * N * 4
    per_step = 2 * wbytes + 6 * act_bytes + 2 * mask_bytes + N * C * 4 + inter_bytes
    vmem_limit = int(min(100 * 1024 * 1024, max(32 * 1024 * 1024, 2 * per_step)))

    kernel = functools.partial(_stack_kernel, no_heads=no_heads, nb=nb,
                               eps=float(eps), with_dropout=with_dropout,
                               inv_keep=float(inv_keep))

    return pl.pallas_call(
        kernel,
        out_shape=jax.ShapeDtypeStruct(s.shape, s.dtype),
        grid=(B, nb),                               # block (carry) axis innermost
        in_specs=in_specs,
        out_specs=act_spec,
        scratch_shapes=[pltpu.VMEM((N, C), jnp.float32)],   # activation carried across blocks
        compiler_params=pltpu.CompilerParams(
            dimension_semantics=("parallel", "arbitrary"),  # batch shardable, blocks sequential
            vmem_limit_bytes=vmem_limit),
    )(*inputs)


# ------------------------- pure-JAX reference (for the check) -------------------------

def _block_reference(s, p, *, no_heads, eps=1e-5):
    def ln(x, w, b):
        mu = jnp.mean(x, -1, keepdims=True)
        var = jnp.mean(jnp.square(x - mu), -1, keepdims=True)
        return (x - mu) / jnp.sqrt(var + eps) * w + b

    B, N, C = s.shape
    dm = p["wq"].shape[1]
    dh = dm // no_heads

    s1 = ln(s, p["ln1_w"], p["ln1_b"])
    q = (s1 @ p["wq"]).reshape(B, N, no_heads, dh) / jnp.sqrt(jnp.float32(dh))
    k = (s1 @ p["wk"]).reshape(B, N, no_heads, dh)
    v = (s1 @ p["wv"]).reshape(B, N, no_heads, dh)
    a = jax.nn.softmax(jnp.einsum("bqhd,bkhd->bhqk", q, k), axis=-1)
    o = jnp.einsum("bhqk,bkhd->bqhd", a, v).reshape(B, N, dm)
    g = jax.nn.sigmoid(s1 @ p["wg"] + p["bg"])
    attn = (o * g) @ p["wo"] + p["bo"]
    s = s + p["gamma1"] * attn

    y = ln(s, p["ln2_w"], p["ln2_b"])
    h = jax.nn.relu(y @ p["w1"] + p["b1"])
    m = jax.nn.relu(h @ p["w2"] + p["b2"])
    return s + p["gamma2"] * m


# ------------------------- parameter construction -------------------------

def init_block_params(key, c_s, c_hidden, no_heads):
    dm = c_hidden * no_heads
    ks = jax.random.split(key, 11)

    def dense(k, fan_in, fan_out):
        return (jax.random.normal(k, (fan_in, fan_out), jnp.float32)
                / jnp.sqrt(jnp.float32(fan_in)))

    # NOTE: the PyTorch module inits gamma1/gamma2 to 1e-6; we use a larger value here so the
    # numeric check actually exercises the attention / MLP paths.
    return dict(
        ln1_w=1.0 + 0.1 * jax.random.normal(ks[0], (1, c_s), jnp.float32),
        ln1_b=0.1 * jax.random.normal(ks[1], (1, c_s), jnp.float32),
        wq=dense(ks[2], c_s, dm),
        wk=dense(ks[3], c_s, dm),
        wv=dense(ks[4], c_s, dm),
        wg=dense(ks[5], c_s, dm),
        bg=jnp.ones((1, dm), jnp.float32),          # gating bias init = 1 (openfold)
        wo=dense(ks[6], dm, c_s),
        bo=jnp.zeros((1, c_s), jnp.float32),
        gamma1=jnp.full((1, c_s), 0.5, jnp.float32),
        ln2_w=1.0 + 0.1 * jax.random.normal(ks[7], (1, c_s), jnp.float32),
        ln2_b=0.1 * jax.random.normal(ks[8], (1, c_s), jnp.float32),
        w1=dense(ks[9], c_s, 4 * c_s),
        b1=jnp.zeros((1, 4 * c_s), jnp.float32),
        w2=dense(ks[10], 4 * c_s, c_s),
        b2=jnp.zeros((1, c_s), jnp.float32),
        gamma2=jnp.full((1, c_s), 0.5, jnp.float32),
    )


if __name__ == "__main__":
    key = jax.random.PRNGKey(0)
    B, N = 2, 8
    c_s, c_hidden, no_heads, no_blocks = 32, 8, 4, 2
    dropout_rate = 0.1   # only active in training mode

    k_x, k_p = jax.random.split(key)
    s = jax.random.normal(k_x, (B, N, c_s), jnp.float32)
    block_keys = jax.random.split(k_p, no_blocks)
    blocks = [init_block_params(bk, c_s, c_hidden, no_heads) for bk in block_keys]

    # Eval-mode forward (dropout = identity), the standard inference path.
    out = decoy_seq_stack_forward(s, blocks, no_heads=no_heads,
                                  dropout_rate=dropout_rate, training=False)
    out = jax.block_until_ready(out)

    ref = s
    for p in blocks:
        ref = _block_reference(ref, p, no_heads=no_heads)

    assert out.shape == s.shape and out.dtype == s.dtype
    # bf16 matmuls in the kernel vs. an f32 reference -> loosened tolerance.
    max_err = float(jnp.max(jnp.abs(out - ref)))
    assert max_err < 5e-2, max_err

    # Training-mode forward: host-drawn int8 keep-masks applied in f32 inside the kernel.
    out_tr = decoy_seq_stack_forward(s, blocks, no_heads=no_heads,
                                     dropout_rate=dropout_rate, training=True,
                                     rng=jax.random.PRNGKey(123))
    out_tr = jax.block_until_ready(out_tr)
    assert out_tr.shape == s.shape
    assert bool(jnp.all(jnp.isfinite(out_tr)))

    print("KERNEL_OK")
</pallas_src>

<mosaic_0001>
module attributes {stable_mosaic.version = 11 : i64} {
  func.func @_stack_kernel(%arg0: i32, %arg1: i32, %arg2: memref<1x8x32xf32, #tpu.memory_space<vmem>>, %arg3: memref<1x1x32xf32, #tpu.memory_space<vmem>>, %arg4: memref<1x1x32xf32, #tpu.memory_space<vmem>>, %arg5: memref<1x32x128xbf16, #tpu.memory_space<vmem>>, %arg6: memref<1x1x32xf32, #tpu.memory_space<vmem>>, %arg7: memref<1x32x32xbf16, #tpu.memory_space<vmem>>, %arg8: memref<1x1x32xf32, #tpu.memory_space<vmem>>, %arg9: memref<1x1x32xf32, #tpu.memory_space<vmem>>, %arg10: memref<1x1x32xf32, #tpu.memory_space<vmem>>, %arg11: memref<1x32x128xbf16, #tpu.memory_space<vmem>>, %arg12: memref<1x1x128xf32, #tpu.memory_space<vmem>>, %arg13: memref<1x128x32xbf16, #tpu.memory_space<vmem>>, %arg14: memref<1x1x32xf32, #tpu.memory_space<vmem>>, %arg15: memref<1x1x32xf32, #tpu.memory_space<vmem>>, %arg16: memref<1x8x32xf32, #tpu.memory_space<vmem>>, %arg17: memref<8x32xf32, #tpu.memory_space<vmem>>) attributes {dimension_semantics = [#tpu.dimension_semantics<parallel>, #tpu.dimension_semantics<arbitrary>], iteration_bounds = array<i64: 2, 2>, scalar_prefetch = 0 : i64, scratch_operands = 1 : i64, tpu.core_type = #tpu.core_type<tc>, window_params = [{transform_indices = @transform_0, window_bounds = array<i64: 1, 8, 32>}, {transform_indices = @transform_1, window_bounds = array<i64: 1, 1, 32>}, {transform_indices = @transform_2, window_bounds = array<i64: 1, 1, 32>}, {transform_indices = @transform_3, window_bounds = array<i64: 1, 32, 128>}, {transform_indices = @transform_4, window_bounds = array<i64: 1, 1, 32>}, {transform_indices = @transform_5, window_bounds = array<i64: 1, 32, 32>}, {transform_indices = @transform_6, window_bounds = array<i64: 1, 1, 32>}, {transform_indices = @transform_7, window_bounds = array<i64: 1, 1, 32>}, {transform_indices = @transform_8, window_bounds = array<i64: 1, 1, 32>}, {transform_indices = @transform_9, window_bounds = array<i64: 1, 32, 128>}, {transform_indices = @transform_10, window_bounds = array<i64: 1, 1, 128>}, {transform_indices = @transform_11, window_bounds = array<i64: 1, 128, 32>}, {transform_indices = @transform_12, window_bounds = array<i64: 1, 1, 32>}, {transform_indices = @transform_13, window_bounds = array<i64: 1, 1, 32>}, {transform_indices = @transform_14, window_bounds = array<i64: 1, 8, 32>}]} {
    %c0_i32 = arith.constant 0 : i32
    %0 = arith.cmpi eq, %arg1, %c0_i32 : i32
    %1 = arith.extui %0 : i1 to i32
    %c0_i32_0 = arith.constant 0 : i32
    %2 = arith.cmpi ne, %1, %c0_i32_0 : i32
    scf.if %2 {
      %c0_76 = arith.constant 0 : index
      %c0_77 = arith.constant 0 : index
      %c0_78 = arith.constant 0 : index
      %186 = vector.load %arg2[%c0_76, %c0_77, %c0_78] : memref<1x8x32xf32, #tpu.memory_space<vmem>>, vector<1x8x32xf32>
      %187 = vector.shape_cast %186 : vector<1x8x32xf32> to vector<8x32xf32>
      %c0_79 = arith.constant 0 : index
      %c0_80 = arith.constant 0 : index
      %188 = vector.load %arg17[%c0_79, %c0_80] : memref<8x32xf32, #tpu.memory_space<vmem>>, vector<8x32xf32>
      tpu.vector_store %arg17[%c0_79, %c0_80], %187 {strides = array<i32>} : memref<8x32xf32, #tpu.memory_space<vmem>>, vector<8x32xf32>,
    } else {
    }
    %c0 = arith.constant 0 : index
    %c0_1 = arith.constant 0 : index
    %3 = vector.load %arg17[%c0, %c0_1] : memref<8x32xf32, #tpu.memory_space<vmem>>, vector<8x32xf32>
    %cst = arith.constant dense<0.000000e+00> : vector<8xf32>
    %4 = vector.multi_reduction <add>, %3, %cst [1] : vector<8x32xf32> to vector<8xf32>
    %5 = vector.shape_cast %4 : vector<8xf32> to vector<8x1xf32>
    %cst_2 = arith.constant 3.200000e+01 : f32
    %6 = vector.broadcast %cst_2 : f32 to vector<8x1xf32>
    %7 = arith.divf %5, %6 : vector<8x1xf32>
    %8 = vector.broadcast %7 : vector<8x1xf32> to vector<8x32xf32>
    %9 = arith.subf %3, %8 : vector<8x32xf32>
    %10 = arith.mulf %9, %9 : vector<8x32xf32>
    %cst_3 = arith.constant dense<0.000000e+00> : vector<8xf32>
    %11 = vector.multi_reduction <add>, %10, %cst_3 [1] : vector<8x32xf32> to vector<8xf32>
    %12 = vector.shape_cast %11 : vector<8xf32> to vector<8x1xf32>
    %cst_4 = arith.constant 3.200000e+01 : f32
    %13 = vector.broadcast %cst_4 : f32 to vector<8x1xf32>
    %14 = arith.divf %12, %13 : vector<8x1xf32>
    %15 = vector.broadcast %7 : vector<8x1xf32> to vector<8x32xf32>
    %16 = arith.subf %3, %15 : vector<8x32xf32>
    %cst_5 = arith.constant 9.99999974E-6 : f32
    %17 = vector.broadcast %cst_5 : f32 to vector<8x1xf32>
    %18 = arith.addf %14, %17 : vector<8x1xf32>
    %19 = math.rsqrt %18 : vector<8x1xf32>
    %20 = vector.broadcast %19 : vector<8x1xf32> to vector<8x32xf32>
    %21 = arith.mulf %16, %20 : vector<8x32xf32>
    %c0_6 = arith.constant 0 : index
    %c0_7 = arith.constant 0 : index
    %c0_8 = arith.constant 0 : index
    %22 = vector.load %arg3[%c0_6, %c0_7, %c0_8] : memref<1x1x32xf32, #tpu.memory_space<vmem>>, vector<1x1x32xf32>
    %23 = vector.shape_cast %22 : vector<1x1x32xf32> to vector<1x32xf32>
    %24 = vector.broadcast %23 : vector<1x32xf32> to vector<8x32xf32>
    %25 = arith.mulf %21, %24 : vector<8x32xf32>
    %c0_9 = arith.constant 0 : index
    %c0_10 = arith.constant 0 : index
    %c0_11 = arith.constant 0 : index
    %26 = vector.load %arg4[%c0_9, %c0_10, %c0_11] : memref<1x1x32xf32, #tpu.memory_space<vmem>>, vector<1x1x32xf32>
    %27 = vector.shape_cast %26 : vector<1x1x32xf32> to vector<1x32xf32>
    %28 = vector.broadcast %27 : vector<1x32xf32> to vector<8x32xf32>
    %29 = arith.addf %25, %28 : vector<8x32xf32>
    %30 = arith.truncf %29 : vector<8x32xf32> to vector<8x32xbf16>
    %c0_12 = arith.constant 0 : index
    %c0_13 = arith.constant 0 : index
    %c0_14 = arith.constant 0 : index
    %31 = vector.load %arg5[%c0_12, %c0_13, %c0_14] : memref<1x32x128xbf16, #tpu.memory_space<vmem>>, vector<1x32x128xbf16>
    %32 = vector.shape_cast %31 : vector<1x32x128xbf16> to vector<32x128xbf16>
    %cst_15 = arith.constant dense<0.000000e+00> : vector<8x128xf32>
    %33 = tpu.matmul %30, %32, %cst_15 {dimension_numbers = #tpu.dot_dimension_numbers<[1], [0], [0], [1], [0, 0, 1, 1], [], []>} : vector<8x32xbf16>, vector<32x128xbf16>, vector<8x128xf32> -> vector<8x128xf32>
    %34 = vector.extract_strided_slice %33 {offsets = [0, 96], sizes = [8, 32], strides = [1, 1]} : vector<8x128xf32> to vector<8x32xf32>
    %c0_16 = arith.constant 0 : index
    %c0_17 = arith.constant 0 : index
    %c0_18 = arith.constant 0 : index
    %35 = vector.load %arg6[%c0_16, %c0_17, %c0_18] : memref<1x1x32xf32, #tpu.memory_space<vmem>>, vector<1x1x32xf32>
    %36 = vector.shape_cast %35 : vector<1x1x32xf32> to vector<1x32xf32>
    %37 = vector.broadcast %36 : vector<1x32xf32> to vector<8x32xf32>
    %38 = arith.addf %34, %37 : vector<8x32xf32>
    %39 = arith.negf %38 : vector<8x32xf32>
    %40 = math.exp %39 : vector<8x32xf32>
    %cst_19 = arith.constant 1.000000e+00 : f32
    %41 = vector.broadcast %cst_19 : f32 to vector<8x32xf32>
    %42 = arith.addf %41, %40 : vector<8x32xf32>
    %43 = arith.divf %41, %42 : vector<8x32xf32>
    %44 = vector.extract_strided_slice %33 {offsets = [0, 0], sizes = [8, 8], strides = [1, 1]} : vector<8x128xf32> to vector<8x8xf32>
    %45 = arith.truncf %44 : vector<8x8xf32> to vector<8x8xbf16>
    %46 = vector.extract_strided_slice %33 {offsets = [0, 32], sizes = [8, 8], strides = [1, 1]} : vector<8x128xf32> to vector<8x8xf32>
    %47 = arith.truncf %46 : vector<8x8xf32> to vector<8x8xbf16>
    %48 = vector.extract_strided_slice %33 {offsets = [0, 64], sizes = [8, 8], strides = [1, 1]} : vector<8x128xf32> to vector<8x8xf32>
    %49 = arith.truncf %48 : vector<8x8xf32> to vector<8x8xbf16>
    %cst_20 = arith.constant dense<0.000000e+00> : vector<8x8xf32>
    %50 = tpu.matmul %45, %47, %cst_20 {dimension_numbers = #tpu.dot_dimension_numbers<[1], [1], [0], [0], [0, 0, 1, 0], [], []>} : vector<8x8xbf16>, vector<8x8xbf16>, vector<8x8xf32> -> vector<8x8xf32>
    %cst_21 = arith.constant dense<0xFF800000> : vector<8xf32>
    %51 = vector.multi_reduction <maximumf>, %50, %cst_21 [1] : vector<8x8xf32> to vector<8xf32>
    %52 = vector.shape_cast %51 : vector<8xf32> to vector<8x1xf32>
    %53 = vector.broadcast %52 : vector<8x1xf32> to vector<8x8xf32>
    %54 = arith.subf %50, %53 : vector<8x8xf32>
    %55 = math.exp %54 : vector<8x8xf32>
    %cst_22 = arith.constant dense<0.000000e+00> : vector<8xf32>
    %56 = vector.multi_reduction <add>, %55, %cst_22 [1] : vector<8x8xf32> to vector<8xf32>
    %57 = vector.shape_cast %56 : vector<8xf32> to vector<8x1xf32>
    %58 = tpu.reciprocal %57 {approx = true} : vector<8x1xf32> -> vector<8x1xf32>
    %59 = vector.broadcast %58 : vector<8x1xf32> to vector<8x8xf32>
    %60 = arith.mulf %55, %59 : vector<8x8xf32>
    %61 = arith.truncf %60 : vector<8x8xf32> to vector<8x8xbf16>
    %cst_23 = arith.constant dense<0.000000e+00> : vector<8x8xf32>
    %62 = tpu.matmul %61, %49, %cst_23 {dimension_numbers = #tpu.dot_dimension_numbers<[1], [0], [0], [1], [0, 0, 1, 1], [], []>} : vector<8x8xbf16>, vector<8x8xbf16>, vector<8x8xf32> -> vector<8x8xf32>
    %63 = vector.extract_strided_slice %33 {offsets = [0, 8], sizes = [8, 8], strides = [1, 1]} : vector<8x128xf32> to vector<8x8xf32>
    %64 = arith.truncf %63 : vector<8x8xf32> to vector<8x8xbf16>
    %65 = vector.extract_strided_slice %33 {offsets = [0, 40], sizes = [8, 8], strides = [1, 1]} : vector<8x128xf32> to vector<8x8xf32>
    %66 = arith.truncf %65 : vector<8x8xf32> to vector<8x8xbf16>
    %67 = vector.extract_strided_slice %33 {offsets = [0, 72], sizes = [8, 8], strides = [1, 1]} : vector<8x128xf32> to vector<8x8xf32>
    %68 = arith.truncf %67 : vector<8x8xf32> to vector<8x8xbf16>
    %cst_24 = arith.constant dense<0.000000e+00> : vector<8x8xf32>
    %69 = tpu.matmul %64, %66, %cst_24 {dimension_numbers = #tpu.dot_dimension_numbers<[1], [1], [0], [0], [0, 0, 1, 0], [], []>} : vector<8x8xbf16>, vector<8x8xbf16>, vector<8x8xf32> -> vector<8x8xf32>
    %cst_25 = arith.constant dense<0xFF800000> : vector<8xf32>
    %70 = vector.multi_reduction <maximumf>, %69, %cst_25 [1] : vector<8x8xf32> to vector<8xf32>
    %71 = vector.shape_cast %70 : vector<8xf32> to vector<8x1xf32>
    %72 = vector.broadcast %71 : vector<8x1xf32> to vector<8x8xf32>
    %73 = arith.subf %69, %72 : vector<8x8xf32>
    %74 = math.exp %73 : vector<8x8xf32>
    %cst_26 = arith.constant dense<0.000000e+00> : vector<8xf32>
    %75 = vector.multi_reduction <add>, %74, %cst_26 [1] : vector<8x8xf32> to vector<8xf32>
    %76 = vector.shape_cast %75 : vector<8xf32> to vector<8x1xf32>
    %77 = tpu.reciprocal %76 {approx = true} : vector<8x1xf32> -> vector<8x1xf32>
    %78 = vector.broadcast %77 : vector<8x1xf32> to vector<8x8xf32>
    %79 = arith.mulf %74, %78 : vector<8x8xf32>
    %80 = arith.truncf %79 : vector<8x8xf32> to vector<8x8xbf16>
    %cst_27 = arith.constant dense<0.000000e+00> : vector<8x8xf32>
    %81 = tpu.matmul %80, %68, %cst_27 {dimension_numbers = #tpu.dot_dimension_numbers<[1], [0], [0], [1], [0, 0, 1, 1], [], []>} : vector<8x8xbf16>, vector<8x8xbf16>, vector<8x8xf32> -> vector<8x8xf32>
    %82 = vector.extract_strided_slice %33 {offsets = [0, 16], sizes = [8, 8], strides = [1, 1]} : vector<8x128xf32> to vector<8x8xf32>
    %83 = arith.truncf %82 : vector<8x8xf32> to vector<8x8xbf16>
    %84 = vector.extract_strided_slice %33 {offsets = [0, 48], sizes = [8, 8], strides = [1, 1]} : vector<8x128xf32> to vector<8x8xf32>
    %85 = arith.truncf %84 : vector<8x8xf32> to vector<8x8xbf16>
    %86 = vector.extract_strided_slice %33 {offsets = [0, 80], sizes = [8, 8], strides = [1, 1]} : vector<8x128xf32> to vector<8x8xf32>
    %87 = arith.truncf %86 : vector<8x8xf32> to vector<8x8xbf16>
    %cst_28 = arith.constant dense<0.000000e+00> : vector<8x8xf32>
    %88 = tpu.matmul %83, %85, %cst_28 {dimension_numbers = #tpu.dot_dimension_numbers<[1], [1], [0], [0], [0, 0, 1, 0], [], []>} : vector<8x8xbf16>, vector<8x8xbf16>, vector<8x8xf32> -> vector<8x8xf32>
    %cst_29 = arith.constant dense<0xFF800000> : vector<8xf32>
    %89 = vector.multi_reduction <maximumf>, %88, %cst_29 [1] : vector<8x8xf32> to vector<8xf32>
    %90 = vector.shape_cast %89 : vector<8xf32> to vector<8x1xf32>
    %91 = vector.broadcast %90 : vector<8x1xf32> to vector<8x8xf32>
    %92 = arith.subf %88, %91 : vector<8x8xf32>
    %93 = math.exp %92 : vector<8x8xf32>
    %cst_30 = arith.constant dense<0.000000e+00> : vector<8xf32>
    %94 = vector.multi_reduction <add>, %93, %cst_30 [1] : vector<8x8xf32> to vector<8xf32>
    %95 = vector.shape_cast %94 : vector<8xf32> to vector<8x1xf32>
    %96 = tpu.reciprocal %95 {approx = true} : vector<8x1xf32> -> vector<8x1xf32>
    %97 = vector.broadcast %96 : vector<8x1xf32> to vector<8x8xf32>
    %98 = arith.mulf %93, %97 : vector<8x8xf32>
    %99 = arith.truncf %98 : vector<8x8xf32> to vector<8x8xbf16>
    %cst_31 = arith.constant dense<0.000000e+00> : vector<8x8xf32>
    %100 = tpu.matmul %99, %87, %cst_31 {dimension_numbers = #tpu.dot_dimension_numbers<[1], [0], [0], [1], [0, 0, 1, 1], [], []>} : vector<8x8xbf16>, vector<8x8xbf16>, vector<8x8xf32> -> vector<8x8xf32>
    %101 = vector.extract_strided_slice %33 {offsets = [0, 24], sizes = [8, 8], strides = [1, 1]} : vector<8x128xf32> to vector<8x8xf32>
    %102 = arith.truncf %101 : vector<8x8xf32> to vector<8x8xbf16>
    %103 = vector.extract_strided_slice %33 {offsets = [0, 56], sizes = [8, 8], strides = [1, 1]} : vector<8x128xf32> to vector<8x8xf32>
    %104 = arith.truncf %103 : vector<8x8xf32> to vector<8x8xbf16>
    %105 = vector.extract_strided_slice %33 {offsets = [0, 88], sizes = [8, 8], strides = [1, 1]} : vector<8x128xf32> to vector<8x8xf32>
    %106 = arith.truncf %105 : vector<8x8xf32> to vector<8x8xbf16>
    %cst_32 = arith.constant dense<0.000000e+00> : vector<8x8xf32>
    %107 = tpu.matmul %102, %104, %cst_32 {dimension_numbers = #tpu.dot_dimension_numbers<[1], [1], [0], [0], [0, 0, 1, 0], [], []>} : vector<8x8xbf16>, vector<8x8xbf16>, vector<8x8xf32> -> vector<8x8xf32>
    %cst_33 = arith.constant dense<0xFF800000> : vector<8xf32>
    %108 = vector.multi_reduction <maximumf>, %107, %cst_33 [1] : vector<8x8xf32> to vector<8xf32>
    %109 = vector.shape_cast %108 : vector<8xf32> to vector<8x1xf32>
    %110 = vector.broadcast %109 : vector<8x1xf32> to vector<8x8xf32>
    %111 = arith.subf %107, %110 : vector<8x8xf32>
    %112 = math.exp %111 : vector<8x8xf32>
    %cst_34 = arith.constant dense<0.000000e+00> : vector<8xf32>
    %113 = vector.multi_reduction <add>, %112, %cst_34 [1] : vector<8x8xf32> to vector<8xf32>
    %114 = vector.shape_cast %113 : vector<8xf32> to vector<8x1xf32>
    %115 = tpu.reciprocal %114 {approx = true} : vector<8x1xf32> -> vector<8x1xf32>
    %116 = vector.broadcast %115 : vector<8x1xf32> to vector<8x8xf32>
    %117 = arith.mulf %112, %116 : vector<8x8xf32>
    %118 = arith.truncf %117 : vector<8x8xf32> to vector<8x8xbf16>
    %cst_35 = arith.constant dense<0.000000e+00> : vector<8x8xf32>
    %119 = tpu.matmul %118, %106, %cst_35 {dimension_numbers = #tpu.dot_dimension_numbers<[1], [0], [0], [1], [0, 0, 1, 1], [], []>} : vector<8x8xbf16>, vector<8x8xbf16>, vector<8x8xf32> -> vector<8x8xf32>
    %120 = tpu.concatenate %62, %81, %100, %119 in 1 : vector<8x8xf32>, vector<8x8xf32>, vector<8x8xf32>, vector<8x8xf32> -> vector<8x32xf32>
    %121 = arith.mulf %120, %43 : vector<8x32xf32>
    %122 = arith.truncf %121 : vector<8x32xf32> to vector<8x32xbf16>
    %c0_36 = arith.constant 0 : index
    %c0_37 = arith.constant 0 : index
    %c0_38 = arith.constant 0 : index
    %123 = vector.load %arg7[%c0_36, %c0_37, %c0_38] : memref<1x32x32xbf16, #tpu.memory_space<vmem>>, vector<1x32x32xbf16>
    %124 = vector.shape_cast %123 : vector<1x32x32xbf16> to vector<32x32xbf16>
    %cst_39 = arith.constant dense<0.000000e+00> : vector<8x32xf32>
    %125 = tpu.matmul %122, %124, %cst_39 {dimension_numbers = #tpu.dot_dimension_numbers<[1], [0], [0], [1], [0, 0, 1, 1], [], []>} : vector<8x32xbf16>, vector<32x32xbf16>, vector<8x32xf32> -> vector<8x32xf32>
    %c0_40 = arith.constant 0 : index
    %c0_41 = arith.constant 0 : index
    %c0_42 = arith.constant 0 : index
    %126 = vector.load %arg8[%c0_40, %c0_41, %c0_42] : memref<1x1x32xf32, #tpu.memory_space<vmem>>, vector<1x1x32xf32>
    %127 = vector.shape_cast %126 : vector<1x1x32xf32> to vector<1x32xf32>
    %128 = vector.broadcast %127 : vector<1x32xf32> to vector<8x32xf32>
    %129 = arith.addf %125, %128 : vector<8x32xf32>
    %130 = arith.addf %3, %129 : vector<8x32xf32>
    %cst_43 = arith.constant dense<0.000000e+00> : vector<8xf32>
    %131 = vector.multi_reduction <add>, %130, %cst_43 [1] : vector<8x32xf32> to vector<8xf32>
    %132 = vector.shape_cast %131 : vector<8xf32> to vector<8x1xf32>
    %cst_44 = arith.constant 3.200000e+01 : f32
    %133 = vector.broadcast %cst_44 : f32 to vector<8x1xf32>
    %134 = arith.divf %132, %133 : vector<8x1xf32>
    %135 = vector.broadcast %134 : vector<8x1xf32> to vector<8x32xf32>
    %136 = arith.subf %130, %135 : vector<8x32xf32>
    %137 = arith.mulf %136, %136 : vector<8x32xf32>
    %cst_45 = arith.constant dense<0.000000e+00> : vector<8xf32>
    %138 = vector.multi_reduction <add>, %137, %cst_45 [1] : vector<8x32xf32> to vector<8xf32>
    %139 = vector.shape_cast %138 : vector<8xf32> to vector<8x1xf32>
    %cst_46 = arith.constant 3.200000e+01 : f32
    %140 = vector.broadcast %cst_46 : f32 to vector<8x1xf32>
    %141 = arith.divf %139, %140 : vector<8x1xf32>
    %142 = vector.broadcast %134 : vector<8x1xf32> to vector<8x32xf32>
    %143 = arith.subf %130, %142 : vector<8x32xf32>
    %cst_47 = arith.constant 9.99999974E-6 : f32
    %144 = vector.broadcast %cst_47 : f32 to vector<8x1xf32>
    %145 = arith.addf %141, %144 : vector<8x1xf32>
    %146 = math.rsqrt %145 : vector<8x1xf32>
    %147 = vector.broadcast %146 : vector<8x1xf32> to vector<8x32xf32>
    %148 = arith.mulf %143, %147 : vector<8x32xf32>
    %c0_48 = arith.constant 0 : index
    %c0_49 = arith.constant 0 : index
    %c0_50 = arith.constant 0 : index
    %149 = vector.load %arg9[%c0_48, %c0_49, %c0_50] : memref<1x1x32xf32, #tpu.memory_space<vmem>>, vector<1x1x32xf32>
    %150 = vector.shape_cast %149 : vector<1x1x32xf32> to vector<1x32xf32>
    %151 = vector.broadcast %150 : vector<1x32xf32> to vector<8x32xf32>
    %152 = arith.mulf %148, %151 : vector<8x32xf32>
    %c0_51 = arith.constant 0 : index
    %c0_52 = arith.constant 0 : index
    %c0_53 = arith.constant 0 : index
    %153 = vector.load %arg10[%c0_51, %c0_52, %c0_53] : memref<1x1x32xf32, #tpu.memory_space<vmem>>, vector<1x1x32xf32>
    %154 = vector.shape_cast %153 : vector<1x1x32xf32> to vector<1x32xf32>
    %155 = vector.broadcast %154 : vector<1x32xf32> to vector<8x32xf32>
    %156 = arith.addf %152, %155 : vector<8x32xf32>
    %157 = arith.truncf %156 : vector<8x32xf32> to vector<8x32xbf16>
    %c0_54 = arith.constant 0 : index
    %c0_55 = arith.constant 0 : index
    %c0_56 = arith.constant 0 : index
    %158 = vector.load %arg11[%c0_54, %c0_55, %c0_56] : memref<1x32x128xbf16, #tpu.memory_space<vmem>>, vector<1x32x128xbf16>
    %159 = vector.shape_cast %158 : vector<1x32x128xbf16> to vector<32x128xbf16>
    %cst_57 = arith.constant dense<0.000000e+00> : vector<8x128xf32>
    %160 = tpu.matmul %157, %159, %cst_57 {dimension_numbers = #tpu.dot_dimension_numbers<[1], [0], [0], [1], [0, 0, 1, 1], [], []>} : vector<8x32xbf16>, vector<32x128xbf16>, vector<8x128xf32> -> vector<8x128xf32>
    %c0_58 = arith.constant 0 : index
    %c0_59 = arith.constant 0 : index
    %c0_60 = arith.constant 0 : index
    %161 = vector.load %arg12[%c0_58, %c0_59, %c0_60] : memref<1x1x128xf32, #tpu.memory_space<vmem>>, vector<1x1x128xf32>
    %162 = vector.shape_cast %161 : vector<1x1x128xf32> to vector<1x128xf32>
    %163 = vector.broadcast %162 : vector<1x128xf32> to vector<8x128xf32>
    %164 = arith.addf %160, %163 : vector<8x128xf32>
    %cst_61 = arith.constant 0.000000e+00 : f32
    %165 = vector.broadcast %cst_61 : f32 to vector<8x128xf32>
    %166 = arith.maximumf %164, %165 : vector<8x128xf32>
    %167 = arith.truncf %166 : vector<8x128xf32> to vector<8x128xbf16>
    %c0_62 = arith.constant 0 : index
    %c0_63 = arith.constant 0 : index
    %c0_64 = arith.constant 0 : index
    %168 = vector.load %arg13[%c0_62, %c0_63, %c0_64] : memref<1x128x32xbf16, #tpu.memory_space<vmem>>, vector<1x128x32xbf16>
    %169 = vector.shape_cast %168 : vector<1x128x32xbf16> to vector<128x32xbf16>
    %cst_65 = arith.constant dense<0.000000e+00> : vector<8x32xf32>
    %170 = tpu.matmul %167, %169, %cst_65 {dimension_numbers = #tpu.dot_dimension_numbers<[1], [0], [0], [1], [0, 0, 1, 1], [], []>} : vector<8x128xbf16>, vector<128x32xbf16>, vector<8x32xf32> -> vector<8x32xf32>
    %c0_66 = arith.constant 0 : index
    %c0_67 = arith.constant 0 : index
    %c0_68 = arith.constant 0 : index
    %171 = vector.load %arg14[%c0_66, %c0_67, %c0_68] : memref<1x1x32xf32, #tpu.memory_space<vmem>>, vector<1x1x32xf32>
    %172 = vector.shape_cast %171 : vector<1x1x32xf32> to vector<1x32xf32>
    %173 = vector.broadcast %172 : vector<1x32xf32> to vector<8x32xf32>
    %174 = arith.addf %170, %173 : vector<8x32xf32>
    %cst_69 = arith.constant 0.000000e+00 : f32
    %175 = vector.broadcast %cst_69 : f32 to vector<8x32xf32>
    %176 = arith.maximumf %174, %175 : vector<8x32xf32>
    %c0_70 = arith.constant 0 : index
    %c0_71 = arith.constant 0 : index
    %c0_72 = arith.constant 0 : index
    %177 = vector.load %arg15[%c0_70, %c0_71, %c0_72] : memref<1x1x32xf32, #tpu.memory_space<vmem>>, vector<1x1x32xf32>
    %178 = vector.shape_cast %177 : vector<1x1x32xf32> to vector<1x32xf32>
    %179 = vector.broadcast %178 : vector<1x32xf32> to vector<8x32xf32>
    %180 = arith.mulf %179, %176 : vector<8x32xf32>
    %181 = arith.addf %130, %180 : vector<8x32xf32>
    %c0_73 = arith.constant 0 : index
    %c0_74 = arith.constant 0 : index
    %182 = vector.load %arg17[%c0_73, %c0_74] : memref<8x32xf32, #tpu.memory_space<vmem>>, vector<8x32xf32>
    tpu.vector_store %arg17[%c0_73, %c0_74], %181 {strides = array<i32>} : memref<8x32xf32, #tpu.memory_space<vmem>>, vector<8x32xf32>,
    %c1_i32 = arith.constant 1 : i32
    %183 = arith.cmpi eq, %arg1, %c1_i32 : i32
    %184 = arith.extui %183 : i1 to i32
    %c0_i32_75 = arith.constant 0 : i32
    %185 = arith.cmpi ne, %184, %c0_i32_75 : i32
    scf.if %185 {
      %c0_76 = arith.constant 0 : index
      %c0_77 = arith.constant 0 : index
      %c0_78 = arith.constant 0 : index
      %186 = vector.load %arg16[%c0_76, %c0_77, %c0_78] : memref<1x8x32xf32, #tpu.memory_space<vmem>>, vector<1x8x32xf32>
      %187 = vector.shape_cast %186 : vector<1x8x32xf32> to vector<8x32xf32>
      %188 = vector.shape_cast %181 : vector<8x32xf32> to vector<1x8x32xf32>
      tpu.vector_store %arg16[%c0_76, %c0_77, %c0_78], %188 {strides = array<i32>} : memref<1x8x32xf32, #tpu.memory_space<vmem>>, vector<1x8x32xf32>,
    } else {
    }
    return
  }
  func.func @transform_0(%arg0: i32, %arg1: i32) -> (i32, i32, i32) {
    %c0_i32 = arith.constant 0 : i32
    %c0_i32_0 = arith.constant 0 : i32
    %c0_i32_1 = arith.constant 0 : i32
    return %arg0, %c0_i32, %c0_i32_0 : i32, i32, i32
  }
  func.func @transform_1(%arg0: i32, %arg1: i32) -> (i32, i32, i32) {
    %c0_i32 = arith.constant 0 : i32
    %c0_i32_0 = arith.constant 0 : i32
    %c0_i32_1 = arith.constant 0 : i32
    return %arg1, %c0_i32, %c0_i32_0 : i32, i32, i32
  }
  func.func @transform_2(%arg0: i32, %arg1: i32) -> (i32, i32, i32) {
    %c0_i32 = arith.constant 0 : i32
    %c0_i32_0 = arith.constant 0 : i32
    %c0_i32_1 = arith.constant 0 : i32
    return %arg1, %c0_i32, %c0_i32_0 : i32, i32, i32
  }
  func.func @transform_3(%arg0: i32, %arg1: i32) -> (i32, i32, i32) {
    %c0_i32 = arith.constant 0 : i32
    %c0_i32_0 = arith.constant 0 : i32
    %c0_i32_1 = arith.constant 0 : i32
    return %arg1, %c0_i32, %c0_i32_0 : i32, i32, i32
  }
  func.func @transform_4(%arg0: i32, %arg1: i32) -> (i32, i32, i32) {
    %c0_i32 = arith.constant 0 : i32
    %c0_i32_0 = arith.constant 0 : i32
    %c0_i32_1 = arith.constant 0 : i32
    return %arg1, %c0_i32, %c0_i32_0 : i32, i32, i32
  }
  func.func @transform_5(%arg0: i32, %arg1: i32) -> (i32, i32, i32) {
    %c0_i32 = arith.constant 0 : i32
    %c0_i32_0 = arith.constant 0 : i32
    %c0_i32_1 = arith.constant 0 : i32
    return %arg1, %c0_i32, %c0_i32_0 : i32, i32, i32
  }
  func.func @transform_6(%arg0: i32, %arg1: i32) -> (i32, i32, i32) {
    %c0_i32 = arith.constant 0 : i32
    %c0_i32_0 = arith.constant 0 : i32
    %c0_i32_1 = arith.constant 0 : i32
    return %arg1, %c0_i32, %c0_i32_0 : i32, i32, i32
  }
  func.func @transform_7(%arg0: i32, %arg1: i32) -> (i32, i32, i32) {
    %c0_i32 = arith.constant 0 : i32
    %c0_i32_0 = arith.constant 0 : i32
    %c0_i32_1 = arith.constant 0 : i32
    return %arg1, %c0_i32, %c0_i32_0 : i32, i32, i32
  }
  func.func @transform_8(%arg0: i32, %arg1: i32) -> (i32, i32, i32) {
    %c0_i32 = arith.constant 0 : i32
    %c0_i32_0 = arith.constant 0 : i32
    %c0_i32_1 = arith.constant 0 : i32
    return %arg1, %c0_i32, %c0_i32_0 : i32, i32, i32
  }
  func.func @transform_9(%arg0: i32, %arg1: i32) -> (i32, i32, i32) {
    %c0_i32 = arith.constant 0 : i32
    %c0_i32_0 = arith.constant 0 : i32
    %c0_i32_1 = arith.constant 0 : i32
    return %arg1, %c0_i32, %c0_i32_0 : i32, i32, i32
  }
  func.func @transform_10(%arg0: i32, %arg1: i32) -> (i32, i32, i32) {
    %c0_i32 = arith.constant 0 : i32
    %c0_i32_0 = arith.constant 0 : i32
    %c0_i32_1 = arith.constant 0 : i32
    return %arg1, %c0_i32, %c0_i32_0 : i32, i32, i32
  }
  func.func @transform_11(%arg0: i32, %arg1: i32) -> (i32, i32, i32) {
    %c0_i32 = arith.constant 0 : i32
    %c0_i32_0 = arith.constant 0 : i32
    %c0_i32_1 = arith.constant 0 : i32
    return %arg1, %c0_i32, %c0_i32_0 : i32, i32, i32
  }
  func.func @transform_12(%arg0: i32, %arg1: i32) -> (i32, i32, i32) {
    %c0_i32 = arith.constant 0 : i32
    %c0_i32_0 = arith.constant 0 : i32
    %c0_i32_1 = arith.constant 0 : i32
    return %arg1, %c0_i32, %c0_i32_0 : i32, i32, i32
  }
  func.func @transform_13(%arg0: i32, %arg1: i32) -> (i32, i32, i32) {
    %c0_i32 = arith.constant 0 : i32
    %c0_i32_0 = arith.constant 0 : i32
    %c0_i32_1 = arith.constant 0 : i32
    return %arg1, %c0_i32, %c0_i32_0 : i32, i32, i32
  }
  func.func @transform_14(%arg0: i32, %arg1: i32) -> (i32, i32, i32) {
    %c0_i32 = arith.constant 0 : i32
    %c0_i32_0 = arith.constant 0 : i32
    %c0_i32_1 = arith.constant 0 : i32
    return %arg0, %c0_i32, %c0_i32_0 : i32, i32, i32
  }
}

</mosaic_0001>

<bundles_post_ra>
// kernel: tpu_custom_call.1
= control target key start
LH: loop header
LB: loop body
LE: loop exit
PB: predicated region body
PF: predicated region fallthrough
CT: control target
= control target key end

     0   :  { %s2196_s0 = inlined_call_operand.vmem [shape: f32[2,8,32], index: 0, kind: input, shape index: {}]   ;;  %s2197_s1 = inlined_call_operand.vmem [shape: f32[2,1,32], index: 1, kind: input, shape index: {}]   ;;  %s2198_s2 = inlined_call_operand.vmem [shape: f32[2,1,32], index: 2, kind: input, shape index: {}]   ;;  %s2199_s3 = inlined_call_operand.vmem [shape: bf16[2,32,128], index: 3, kind: input, shape index: {}]   ;;  %s2200_s4 = inlined_call_operand.vmem [shape: f32[2,1,32], index: 4, kind: input, shape index: {}]   ;;  %s2201_s5 = inlined_call_operand.vmem [shape: bf16[2,32,32], index: 5, kind: input, shape index: {}]   ;;  %s2202_s6 = inlined_call_operand.vmem [shape: f32[2,1,32], index: 6, kind: input, shape index: {}]   ;;  %s2203_s7 = inlined_call_operand.vmem [shape: f32[2,1,32], index: 7, kind: input, shape index: {}]   ;;  %s2204_s8 = inlined_call_operand.vmem [shape: f32[2,1,32], index: 8, kind: input, shape index: {}]   ;;  %s2205_s9 = inlined_call_operand.vmem [shape: bf16[2,32,128], index: 9, kind: input, shape index: {}]   ;;  %s2206_s10 = inlined_call_operand.vmem [shape: f32[2,1,128], index: 10, kind: input, shape index: {}]   ;;  %s2207_s11 = inlined_call_operand.vmem [shape: bf16[2,128,32], index: 11, kind: input, shape index: {}]   ;;  %s2208_s12 = inlined_call_operand.vmem [shape: f32[2,1,32], index: 12, kind: input, shape index: {}]   ;;  %s2209_s13 = inlined_call_operand.vmem [shape: f32[2,1,32], index: 13, kind: input, shape index: {}]   ;;  %s2210_s14 = inlined_call_operand.hbm [shape: f32[2,8,32], index: 14, kind: output, shape index: {}]  }
   0x1   :  { %2226 = sst [smem:[#allocation19_spill]] %s2196_s0 }
   0x2   :  { %2227 = sst [smem:[#allocation20_spill]] %s2198_s2 }
   0x3   :  { %2228 = sst [smem:[#allocation21_spill]] %s2199_s3 }
   0x4   :  { %2229 = sst [smem:[#allocation22_spill]] %s2201_s5 }
   0x5   :  { %2230 = sst [smem:[#allocation23_spill]] %s2209_s13 }
   0x6   :  { %2231 = sst [smem:[#allocation24_spill]] %s2210_s14 }
   0x7   :  { %19 = vsyncpa [#allocation4], 0 }
   0x8   :  { %21 = vsyncpa [#allocation4 + $0x1], 0  ;;  %s1871_s29 = smov 0   ;;  %s1873_s30 = smov 0  }
   0x9   :  { %s1875_s15 = smov 0   ;;  %s1877_s16 = smov 0  }
   0xa   :  { %s1879_s17 = smov 0   ;;  %s1881_s18 = smov 0  }
   0xb   :  { %s1883_s19 = smov 0   ;;  %s1885_s20 = smov 0  }
   0xc LB: > { %2232 = sst [smem:[#allocation6_spill]] %s1750_s29  ;;  %s1455_s21 = sadd.s32 4294967295, %s1778_s20   ;;  %s1778_s20 = sphi %s1885_s20, %s27_s20   ;;  %s1774_s19 = sphi %s1883_s19, %s2277_s19   ;;  %s1770_s18 = sphi %s1881_s18, %s2276_s18   ;;  %s1766_s17 = sphi %s1879_s17, %s2275_s17   ;;  %s1762_s16 = sphi %s1877_s16, %s2274_s16   ;;  %s1758_s15 = sphi %s1875_s15, %s2273_s15   ;;  %s1754_s30 = sphi %s1873_s30, %s2272_s30   ;;  %s1750_s29 = sphi %s1871_s29, %s2271_s29  }
   0xd   : > { %2233 = sst [smem:[#allocation7_spill]] %s1754_s30  ;;  %s1456_s22 = sadd.s32 4294967294, %s1778_s20  }
   0xe   : > { %2234 = sst [smem:[#allocation8_spill]] %s1758_s15  ;;  %s36_s23 = sadd.s32 1, %s1770_s18 }
   0xf   : > { %2235 = sst [smem:[#allocation9_spill]] %s1762_s16  ;;  %p37_p0 = scmp.ge.s32.totalorder %s36_s23, 2 }
  0x10   : > { %2236 = sst [smem:[#allocation10_spill]] %s1766_s17  ;;  %s39_s24 = sadd.s32 1, %s1774_s19 }
  0x11   : > { %2237 = sst [smem:[#allocation11_spill]] %s1770_s18  ;;  %p420_p1 = scmp.ne.s32.totalorder %s1758_s15, %s1754_s30 }
  0x12   : > { %2238 = sst [smem:[#allocation12_spill]] %s1774_s19  ;;  %p421_p2 = scmp.eq.s32.totalorder %s1455_s21, 3 }
  0x13   : > { %2239 = sst [smem:[#allocation13_spill]] %s1778_s20  ;;  %s2279_s23 = smov (%p37_p0, %s36_s23), 0 }
  0x14   : > { %2240 = sst [smem:[#allocation14_spill]] %s2279_s23  ;;  %s2281_s24 = smov (!%p37_p0, %s39_s24), %s1774_s19 }
  0x15   : > { %p1920_p3 = por %p421_p2, %p420_p1  ;;  %p426_p4 = scmp.ne.s32.totalorder %s1754_s30, %s1750_s29 }
  0x16   : > { %p41_p5 = scmp.ge.s32.totalorder %s2281_s24, 2  ;;  %p427_p6 = scmp.eq.s32.totalorder %s1456_s22, 3 }
  0x17   : > { %s2241_s25 = scalar_select %p1920_p3, 1, 0 }
  0x18   : > { %p1459_p7 = scmp.ge.s32.totalorder %s1778_s20, 1  ;;  %p538_p8 = scmp.lt.s32.totalorder %s1778_s20, 5 }
  0x19   : > { %2242 = sst [smem:[#allocation15_spill]] %s2241_s25  ;;  %s2283_s24 = smov (%p41_p5, %s2281_s24), 0 }
  0x1a   : > { %2243 = sst [smem:[#allocation16_spill]] %s2283_s24  ;;  %p1930_p9 = por %p427_p6, %p426_p4 }
  0x1b   : > { %p539_p10 = pnand %p1459_p7, %p538_p8  ;;  %s407_s27 = ssub.s32 %s1774_s19, %s2283_s24 }
  0x1c   : > { %s2244_s26 = scalar_select %p1930_p9, 1, 0 }
  0x1d   : > { %s410_s28 = sadd.s32 1, %s1758_s15  ;;  %p408_p11 = scmp.eq.s32.totalorder %s407_s27, 0 }
  0x1e   : > { %2245 = sst [smem:[#allocation17_spill]] %s2244_s26  ;;  %542 = sbr.rel (%p539_p10) target bundleno = 2386 (0x952), region = 76 }
  0x1f   : > { %s1938_s21 = scalar_select %p408_p11, %s1758_s15, %s410_s28  }
  0x20   : > { %s2214_s22 = sand.u32 (!%p539_p10), 1, %s1754_s30   ;;  %p630_p12 = scmp.lt.s32.totalorder (!%p539_p10), %s1766_s17, 1 }
  0x21   : > { %2246 = sst [smem:[#allocation18_spill]] %s1938_s21  ;;  %s1944_s23 = sshll.u32 (!%p539_p10), %s2214_s22, 3 }
  0x22   : > { %p634_p13 = scmp.lt.s32.totalorder (!%p539_p10), %s1762_s16, 1  ;;  %s2247_s0 = sld [smem:[#allocation19_spill]] (!%p539_p10) }
  0x23   : > { %s631_s18 = scalar_select %p630_p12, %s1766_s17, 1 }
  0x24   : > { %s1949_s26 = scalar_select %p634_p13, %s1762_s16, 1 }
  0x25   : > { %s1461_s27 = sshll.u32 %s631_s18, 3  ;;  %s2249_s3 = sld [smem:[#allocation21_spill]] }
  0x26   : > { %s1544_s25 = sshll.u32 %s1949_s26, 4  ;;  %s2250_s5 = sld [smem:[#allocation22_spill]] }
  0x27   : > { %s1992_s18 = scalar_lea.vmem %s2205_s9, %s1544_s25  ;;  %s669_s24 = scalar_lea.vmem %s2206_s10, %s1949_s26 }
  0x28   : > { %s633_s22 = scalar_lea.vmem %s2247_s0, %s1461_s27  ;;  %s677_s29 = scalar_lea.vmem %s2208_s12, %s1949_s26 }
  0x29   : > { %s2252_s13 = sld [smem:[#allocation9_spill]] }
  0x2b   : > { %s1966_s16 = scalar_lea.vmem %s2249_s3, %s1544_s25  ;;  %s2251_s3 = sld [smem:[#allocation23_spill]] }
  0x2c   : > { %s1975_s19 = scalar_lea.vmem %s2250_s5, %s1544_s25  ;;  %s1547_s5 = sshll.u32 %s1949_s26, 6 }
  0x2d   : > { %s2006_s0 = scalar_lea.vmem %s2207_s11, %s1547_s5  ;;  %s629_s25 = scalar_lea.vmem [#allocation3], %s1944_s23 }
  0x2f   : > { %p1470_p0 = scmp.ne.s32.totalorder %s2252_s13, 0 }
  0x31   : > { %s680_s2 = scalar_lea.vmem %s2251_s3, %s1949_s26  ;;  %685 = sbr.rel (%p1470_p0) target bundleno = 56 (0x38), region = 80 }
  0x36   : > { %v686_v0 = vld [vmem:[%s633_s22] sm:$0xff]  ;;  %vm687_vm0 = vcmask 261120  }
  0x37   : > { %688 = vst.msk [vmem:[#allocation2] sm:$0xff] %vm687_vm0, %v686_v0 }
  0x38 PF: > { %vm690_vm1 = vcmask 261120   ;;  %v1780_v3 = vmov 32.0   ;;  %v1549_v15 = vld [vmem:[%s1966_s16 + $0x8] sm:$0xff]  ;;  %v1548_v16 = vld [vmem:[%s1966_s16] sm:$0xff]  ;;  %s2253_s16 = scalar_lea.vmem %s2197_s1, %s1949_s26  ;;  %s2254_s28 = sld [smem:[#allocation20_spill]]  ;;  %vm830_vm6 = vcmask 1043456  }
  0x39   : > { %1658 = vrcp.f32 %v1780_v3  ;;  %756 = vmatpush.bf16.msra.mxu0 %v1549_v15  ;;  %v1649_v26 = vld [vmem:[%s2253_s16] ss:$0 sm:$0xff]  ;;  %s1781_s21 = smov 88   ;;  %s1782_s14 = smov 64   ;;  %vm793_vm7 = vcmask 64512   ;;  %vm1028_vm12 = vcmask 130048  }
  0x3a   : > { %s1783_s20 = smov 96   ;;  %s1784_s30 = smov 72   ;;  %vm1030_vm13 = vcmask 195584  }
  0x3b   : > { %s1785_s17 = smov 80   ;;  %s1786_s13 = smov 120  }
  0x3c   : > { %s1787_s3 = smov 104   ;;  %s1788_s5 = smov 112  }
  0x3d   : > { %757 = vmatpush.bf16.msra.mxu0 %v1548_v16  ;;  %s1789_s16 = smov 40  }
  0x3e   : > { %v2014_v1 = vld [vmem:[#allocation2] sm:$0xff]  ;;  %s2255_s15 = scalar_lea.vmem %s2254_s28, %s1949_s26  ;;  %s2256_s28 = scalar_lea.vmem %s2200_s4, %s1949_s26 }
  0x3f   : > { %v691_v2 = vsel %vm690_vm1, %v2014_v1, 0.0  ;;  %v1659_v4 = vpop.eup %1658  ;;  %v1650_v29 = vld [vmem:[%s2255_s15] ss:$0 sm:$0xff]  ;;  %s1790_s15 = smov 48  }
  0x40   : > { %692 = vadd.xlane.f32.xlu0 %v691_v2  ;;  %v695_v5 = vmul.f32 32.0, %v1659_v4  ;;  %vm699_vm2 = vweird.f32 %v1659_v4 }
  0x42   : > { %v696_v6 = vsub.f32 1.0, %v695_v5 }
  0x44   : > { %v697_v7 = vmul.f32 %v1659_v4, %v696_v6 }
  0x46   : > { %v698_v8 = vadd.f32 %v1659_v4, %v697_v7 }
  0x48   : > { %v2018_v9 = vsel %vm699_vm2, %v1659_v4, %v698_v8 }
  0xb3   : > { %v693_v10 = vpop.xlane.xlu0 %692 }
  0xb4   : > { %v701_v11 = vmul.f32 %v2018_v9, %v693_v10  ;;  %v1651_v10 = vld [vmem:[%s2256_s28] ss:$0 sm:$0xff]  ;;  %s2259_s28 = scalar_lea.vmem %s2204_s8, %s1949_s26 }
  0xb6   : > { %v702_v12 = vsub.f32 %v2014_v1, %v701_v11 }
  0xb8   : > { %v703_v13 = vmul.f32 %v702_v12, %v702_v12 }
  0xba   : > { %v704_v14 = vsel %vm690_vm1, %v703_v13, 0.0 }
  0xbb   : > { %705 = vadd.xlane.f32.xlu0 %v704_v14 }
 0x12e   : > { %v706_v17 = vpop.xlane.xlu0 %705 }
 0x12f   : > { %v707_v18 = vmul.f32 %v706_v17, %v2018_v9 }
 0x131   : > { %v708_v19 = vadd.f32 1e-05, %v707_v18 }
 0x133   : > { %1660 = vrsqrt.f32 %v708_v19  ;;  %vm715_vm4 = vweird.f32 %v708_v19 }
 0x139   : > { %v1661_v20 = vpop.eup %1660 }
 0x13a   : > { %v710_v21 = vmul.f32 %v1661_v20, %v708_v19  ;;  %vm716_vm3 = vweird.f32 %v1661_v20 }
 0x13b   : > { %vm717_vm5 = vmor %vm715_vm4, %vm716_vm3 }
 0x13c   : > { %v711_v22 = vmul.f32 %v1661_v20, %v710_v21 }
 0x13e   : > { %v712_v23 = vmul.f32 0.5, %v711_v22 }
 0x140   : > { %v713_v24 = vsub.f32 1.5, %v712_v23 }
 0x142   : > { %v714_v25 = vmul.f32 %v1661_v20, %v713_v24 }
 0x144   : > { %v718_v27 = vsel %vm717_vm5, %v1661_v20, %v714_v25 }
 0x145   : > { %v719_v28 = vmul.f32 %v718_v27, %v702_v12 }
 0x147   : > { %v724_v30 = vmul.f32 %v1649_v26, %v719_v28 }
 0x149   : > { %v729_v31 = vadd.f32 %v1650_v29, %v724_v30 }
 0x14b   : > { %v730_v32 = vpack.c.bf16 %v729_v31, %v729_v31 }
 0x14d   : > { %1479 = vmatmul.msk.bf16.vlgmr.msra.gmra.mxu0 %vm690_vm1, %v730_v32 }
 0x1ca   : > { %v2037_v33 = vpop.f32.mrf.mxu0 }
 0x1cb   : > { %v2041_v34 = vpack.c.bf16 %v2037_v33, %v2037_v33 }
 0x1cd   : > { %849 = vrot.lane.b32.xlu0 %v2041_v34, %s1781_s21  ;;  %825 = vrot.lane.b32.xlu2 %v2041_v34, %s1782_s14  ;;  %s1791_s21 = smov 56   ;;  %s1792_s14 = smov 32  }
 0x1ce   : > { %791 = vrot.lane.b32.xlu1 %v2041_v34, %s1783_s20 }
 0x1d2   : > { %v761_v35 = vpop.f32.mrf.mxu0 }
 0x1d5   : > { %961 = vrot.lane.b32.xlu0 %v2041_v34, %s1784_s30  ;;  %s1794_s30 = smov 8  }
 0x1dd   : > { %905 = vrot.lane.b32.xlu0 %v2041_v34, %s1785_s17  ;;  %s1795_s17 = smov 24  }
 0x227   : > { %v826_v36 = vpop.permute.xlu2 %825 }
 0x228   : > { %v832_v37 = vsel %vm830_vm6, %v826_v36, 0 }
 0x229   : > { %841 = vmatpush.bf16.msra.mxu2 %v832_v37 }
 0x23f   : > { %v850_v38 = vpop.permute.xlu0 %849 }
 0x240   : > { %v792_v39 = vpop.permute.xlu1 %791  ;;  %v855_v40 = vsel %vm793_vm7, %v850_v38, 0 }
 0x241   : > { %v798_v41 = vsel %vm793_vm7, %v792_v39, 0  ;;  %864 = vmatpush.bf16.xpose.msrb.mxu2 %v855_v40 }
 0x242   : > { %807 = vmatpush.bf16.xpose.msra.mxu1 %v798_v41 }
 0x247   : > { %v962_v42 = vpop.permute.xlu0 %961 }
 0x248   : > { %v967_v43 = vsel %vm793_vm7, %v962_v42, 0 }
 0x249   : > { %1481 = vmatmul.msk.bf16.vlgmr.msra.gmra.mxu1 %vm793_vm7, %v2041_v34  ;;  %976 = vmatpush.bf16.xpose.msra.mxu3 %v967_v43 }
 0x24f   : > { %v906_v44 = vpop.permute.xlu0 %905 }
 0x250   : > { %v911_v45 = vsel %vm793_vm7, %v906_v44, 0 }
 0x251   : > { %920 = vmatpush.bf16.xpose.msrb.mxu0 %v911_v45 }
 0x2c6   : > { %v809_v46 = vpop.f32.mrf.mxu1 }
 0x2c7   : > { %v813_v47 = vsel %vm793_vm7, %v809_v46, -inf }
 0x2c8   : > { %814 = vmax.xlane.f32.xlu1 %v813_v47 }
 0x2ce   : > { %v811_v48 = vpop.f32.mrf.mxu1 }
 0x33b   : > { %v815_v49 = vpop.xlane.xlu1 %814 }
 0x33c   : > { %v816_v50 = vsub.f32 %v809_v46, %v815_v49 }
 0x33e   : > { %v817_v51 = vmul.f32 1.442695, %v816_v50 }
 0x340   : > { %1662 = vpow2.f32 %v817_v51 }
 0x346   : > { %v1663_v52 = vpop.eup %1662 }
 0x347   : > { %v819_v53 = vsel %vm793_vm7, %v1663_v52, 0.0 }
 0x348   : > { %820 = vadd.xlane.f32.xlu2 %v819_v53 }
 0x360   : > { %847 = vrot.lane.b32.xlu2 %v2041_v34, %s1786_s13 }
 0x368   : > { %959 = vrot.lane.b32.xlu2 %v2041_v34, %s1787_s3 }
 0x370   : > { %903 = vrot.lane.b32.xlu2 %v2041_v34, %s1788_s5 }
 0x3bb   : > { %v821_v54 = vpop.xlane.xlu2 %820 }
 0x3bc   : > { %1664 = vrcp.f32 %v821_v54 }
 0x3c2   : > { %v1665_v55 = vpop.eup %1664 }
 0x3c3   : > { %v848_v56 = vpop.permute.xlu2 %847  ;;  %v823_v57 = vmul.f32 %v1665_v55, %v1663_v52 }
 0x3c5   : > { %v824_v58 = vpack.c.bf16 %v823_v57, %v823_v57 }
 0x3c7   : > { %1482 = vmatmul.msk.bf16.vlgmr.msra.gmra.mxu2 %vm793_vm7, %v824_v58 }
 0x3cb   : > { %v960_v59 = vpop.permute.xlu2 %959 }
 0x3cc   : > { %1487 = vmatmul.msk.bf16.vlgmr.msra.gmra.mxu3 %vm793_vm7, %v960_v59 }
 0x3d3   : > { %v904_v60 = vpop.permute.xlu2 %903 }
 0x3d4   : > { %1485 = vmatmul.msk.bf16.vlgmr.msrb.gmra.mxu0 %vm793_vm7, %v904_v60 }
 0x3d7   : > { %1483 = vmatmul.msk.bf16.vlgmr.msrb.gmra.mxu2 %vm793_vm7, %v848_v56 }
 0x44a   : > { %v2065_v61 = vpop.f32.mrf.mxu2 }
 0x44f   : > { %v978_v62 = vpop.f32.mrf.mxu3 }
 0x450   : > { %v982_v63 = vsel %vm793_vm7, %v978_v62, -inf }
 0x451   : > { %983 = vmax.xlane.f32.xlu0 %v982_v63  ;;  %v922_v0 = vpop.f32.mrf.mxu0 }
 0x452   : > { %v845_v2 = vpop.f32.mrf.mxu2  ;;  %v926_v3 = vsel %vm793_vm7, %v922_v0, -inf }
 0x453   : > { %927 = vmax.xlane.f32.xlu2 %v926_v3  ;;  %v1551_v3 = vld [vmem:[%s1975_s19 + $0x8] sm:$0xff] }
 0x454   : > { %1067 = vmatpush.bf16.msra.mxu0 %v1551_v3 }
 0x457   : > { %v980_v4 = vpop.f32.mrf.mxu3 }
 0x458   : > { %v1550_v4 = vld [vmem:[%s1975_s19] sm:$0xff]  ;;  %s2257_s19 = scalar_lea.vmem %s2202_s6, %s1949_s26 }
 0x459   : > { %v924_v5 = vpop.f32.mrf.mxu0  ;;  %1068 = vmatpush.bf16.msra.mxu0 %v1550_v4 }
 0x45a   : > { %v866_v6 = vpop.f32.mrf.mxu2 }
 0x45b   : > { %v870_v7 = vsel %vm793_vm7, %v866_v6, -inf }
 0x45c   : > { %871 = vmax.xlane.f32.xlu1 %v870_v7 }
 0x462   : > { %v868_v8 = vpop.f32.mrf.mxu2 }
 0x46b   : > { %994 = vrot.lane.b32.xlu2 %v2041_v34, %s1789_s16  ;;  %s2258_s16 = scalar_lea.vmem %s2203_s7, %s1949_s26 }
 0x473   : > { %766 = vrot.lane.b32.xlu2 %v1651_v10, %s1783_s20  ;;  %s1793_s20 = smov 16  }
 0x4c4   : > { %v984_v24 = vpop.xlane.xlu0 %983 }
 0x4c5   : > { %v985_v26 = vsub.f32 %v978_v62, %v984_v24 }
 0x4c6   : > { %v928_v11 = vpop.xlane.xlu2 %927 }
 0x4c7   : > { %v929_v12 = vsub.f32 %v922_v0, %v928_v11  ;;  %v986_v27 = vmul.f32 1.442695, %v985_v26  ;;  %v1561_v26 = vld [vmem:[%s2006_s0 + $0x38] sm:$0xff] }
 0x4c8   : > { %1214 = vmatpush.bf16.msrb.mxu3 %v1561_v26 }
 0x4c9   : > { %v930_v13 = vmul.f32 1.442695, %v929_v12 }
 0x4cb   : > { %1666 = vpow2.f32 %v930_v13 }
 0x4ce   : > { %v995_v21 = vpop.permute.xlu2 %994 }
 0x4cf   : > { %v872_v14 = vpop.xlane.xlu1 %871  ;;  %v1000_v53 = vsel %vm830_vm6, %v995_v21, 0 }
 0x4d0   : > { %v873_v15 = vsub.f32 %v866_v6, %v872_v14 }
 0x4d1   : > { %v1667_v16 = vpop.eup %1666 }
 0x4d2   : > { %v874_v17 = vmul.f32 1.442695, %v873_v15  ;;  %v932_v18 = vsel %vm793_vm7, %v1667_v16, 0.0  ;;  %v1652_v15 = vld [vmem:[%s2257_s19] ss:$0 sm:$0xff] }
 0x4d3   : > { %933 = vadd.xlane.f32.xlu0 %v932_v18 }
 0x4d4   : > { %1668 = vpow2.f32 %v874_v17 }
 0x4d6   : > { %v767_v22 = vpop.permute.xlu2 %766 }
 0x4d7   : > { %v769_v23 = vadd.f32 %v767_v22, %v2037_v33 }
 0x4d9   : > { %v1480_v25 = vmul.f32 -1.442695, %v769_v23 }
 0x4da   : > { %v1669_v19 = vpop.eup %1668 }
 0x4db   : > { %v876_v20 = vsel %vm793_vm7, %v1669_v19, 0.0  ;;  %1670 = vpow2.f32 %v1480_v25  ;;  %v1553_v25 = vld [vmem:[%s1992_s18 + $0x8] sm:$0xff] }
 0x4dc   : > { %877 = vadd.xlane.f32.xlu1 %v876_v20  ;;  %1672 = vpow2.f32 %v986_v27 }
 0x4e1   : > { %v1671_v28 = vpop.eup %1670 }
 0x4e2   : > { %v773_v29 = vadd.f32 1.0, %v1671_v28  ;;  %v1673_v30 = vpop.eup %1672 }
 0x4e3   : > { %v988_v31 = vsel %vm793_vm7, %v1673_v30, 0.0 }
 0x4e4   : > { %1674 = vrcp.f32 %v773_v29  ;;  %v785_v33 = vand.u32 2147483648, %v773_v29  ;;  %vm779_vm9 = vweird.f32 %v773_v29  ;;  %v783_v38 = vand.u32 2147483647, %v773_v29 }
 0x4e6   : > { %v786_v40 = vor.u32 1.1754944e-38, %v785_v33  ;;  %vm784_vm11 = vcmp.eq.f32.partialorder %v783_v38, 8.507059e+37 }
 0x4e7   : > { %938 = vrot.lane.b32.xlu0 %v2041_v34, %s1790_s15 }
 0x4ea   : > { %v1675_v32 = vpop.eup %1674 }
 0x4eb   : > { %v775_v35 = vmul.f32 %v1675_v32, %v773_v29  ;;  %vm780_vm8 = vweird.f32 %v1675_v32  ;;  %v1560_v29 = vld [vmem:[%s2006_s0 + $0x30] sm:$0xff] }
 0x4ec   : > { %vm781_vm10 = vmor %vm779_vm9, %vm780_vm8  ;;  %1215 = vmatpush.bf16.msrb.mxu3 %v1560_v29 }
 0x4f5   : > { %882 = vrot.lane.b32.xlu1 %v2041_v34, %s1791_s21  ;;  %v776_v34 = vsub.f32 1.0, %v775_v35 }
 0x4f7   : > { %v777_v36 = vmul.f32 %v1675_v32, %v776_v34 }
 0x4f9   : > { %v778_v37 = vadd.f32 %v1675_v32, %v777_v36  ;;  %v1557_v36 = vld [vmem:[%s2006_s0 + $0x18] sm:$0xff] }
 0x4fb   : > { %v782_v39 = vsel %vm781_vm10, %v1675_v32, %v778_v37  ;;  %v1558_v32 = vld [vmem:[%s2006_s0 + $0x20] sm:$0xff] }
 0x4fc   : > { %v787_v41 = vsel %vm784_vm11, %v786_v40, %v782_v39  ;;  %v1653_v40 = vld [vmem:[%s2258_s16] ss:$0 sm:$0xff] }
 0x51f   : > { %989 = vadd.xlane.f32.xlu1 %v988_v31  ;;  %v1559_v31 = vld [vmem:[%s2006_s0 + $0x28] sm:$0xff] }
 0x520   : > { %1216 = vmatpush.bf16.msrb.mxu3 %v1559_v31 }
 0x524   : > { %1217 = vmatpush.bf16.msrb.mxu3 %v1558_v32 }
 0x528   : > { %1218 = vmatpush.bf16.msrb.mxu3 %v1557_v36 }
 0x538   : > { %1033 = vrot.lane.b32.xlu1 %v787_v41, %s1792_s14 }
 0x546   : > { %v934_v42 = vpop.xlane.xlu0 %933 }
 0x547   : > { %1676 = vrcp.f32 %v934_v42 }
 0x54d   : > { %v1677_v43 = vpop.eup %1676 }
 0x54e   : > { %v936_v44 = vmul.f32 %v1677_v43, %v1667_v16  ;;  %v1654_v43 = vld [vmem:[%s2259_s28] ss:$0 sm:$0xff] }
 0x54f   : > { %v878_v46 = vpop.xlane.xlu1 %877 }
 0x550   : > { %v937_v48 = vpack.c.bf16 %v936_v44, %v936_v44  ;;  %1678 = vrcp.f32 %v878_v46 }
 0x556   : > { %v1679_v49 = vpop.eup %1678 }
 0x557   : > { %v880_v50 = vmul.f32 %v1679_v49, %v1669_v19  ;;  %v1655_v49 = vld [vmem:[%s669_s24] ss:$0 sm:$0xff]  ;;  %s2261_s24 = sld [smem:[#allocation9_spill]] }
 0x559   : > { %v939_v45 = vpop.permute.xlu0 %938  ;;  %v881_v54 = vpack.c.bf16 %v880_v50, %v880_v50 }
 0x55a   : > { %v944_v47 = vsel %vm830_vm6, %v939_v45, 0 }
 0x55b   : > { %953 = vmatpush.bf16.msrb.mxu1 %v944_v47  ;;  %v1555_v47 = vld [vmem:[%s2006_s0 + $0x8] sm:$0xff] }
 0x55d   : > { %p1539_p1 = scmp.ne.s32.totalorder %s2261_s24, 1 }
 0x55e   : > { %1486 = vmatmul.msk.bf16.vlgmr.msrb.gmra.mxu1 %vm793_vm7, %v937_v48  ;;  %v1554_v48 = vld [vmem:[%s2006_s0] sm:$0xff] }
 0x55f   : > { %1137 = vmatpush.bf16.msra.mxu1 %v1553_v25 }
 0x567   : > { %v883_v51 = vpop.permute.xlu1 %882 }
 0x568   : > { %v888_v52 = vsel %vm830_vm6, %v883_v51, 0 }
 0x569   : > { %897 = vmatpush.bf16.msra.mxu2 %v888_v52 }
 0x56c   : > { %1484 = vmatmul.msk.bf16.vlgmr.msra.gmra.mxu2 %vm793_vm7, %v881_v54 }
 0x56d   : > { %1009 = vmatpush.bf16.msrb.mxu2 %v1000_v53 }
 0x592   : > { %v990_v55 = vpop.xlane.xlu1 %989 }
 0x593   : > { %1680 = vrcp.f32 %v990_v55  ;;  %v1656_v55 = vld [vmem:[%s677_s29] ss:$0 sm:$0xff] }
 0x599   : > { %v1681_v56 = vpop.eup %1680 }
 0x59a   : > { %v992_v57 = vmul.f32 %v1681_v56, %v1673_v30 }
 0x59c   : > { %v993_v58 = vpack.c.bf16 %v992_v57, %v992_v57 }
 0x59e   : > { %1488 = vmatmul.msk.bf16.vlgmr.msrb.gmra.mxu2 %vm793_vm7, %v993_v58  ;;  %v1657_v58 = vld [vmem:[%s680_s2] ss:$0 sm:$0xff] }
 0x5aa   : > { %v1034_v11 = vpop.permute.xlu1 %1033 }
 0x5db   : > { %v955_v59 = vpop.f32.mrf.mxu1 }
 0x5dc   : > { %1020 = vrot.lane.b32.xlu2 %v955_v59, %s1793_s20 }
 0x5e3   : > { %v957_v60 = vpop.f32.mrf.mxu1 }
 0x5ef   : > { %v899_v62 = vpop.f32.mrf.mxu2 }
 0x5f0   : > { %1016 = vrot.lane.b32.xlu0 %v899_v62, %s1794_s30 }
 0x5f7   : > { %v901_v63 = vpop.f32.mrf.mxu2 }
 0x621   : > { %v1011_v0 = vpop.f32.mrf.mxu2 }
 0x622   : > { %1024 = vrot.lane.b32.xlu0 %v1011_v0, %s1795_s17 }
 0x629   : > { %v1013_v2 = vpop.f32.mrf.mxu2 }
 0x636   : > { %v1021_v7 = vpop.permute.xlu2 %1020 }
 0x662   : > { %v1017_v5 = vpop.permute.xlu0 %1016 }
 0x663   : > { %v1027_v6 = vsel %vm793_vm7, %v2065_v61, %v1017_v5 }
 0x664   : > { %v1029_v10 = vsel %vm1028_vm12, %v1027_v6, %v1021_v7 }
 0x694   : > { %v1025_v8 = vpop.permute.xlu0 %1024 }
 0x695   : > { %v1031_v12 = vsel %vm1030_vm13, %v1029_v10, %v1025_v8 }
 0x696   : > { %v1036_v13 = vmul.f32 %v1034_v11, %v1031_v12 }
 0x698   : > { %v1037_v14 = vpack.c.bf16 %v1036_v13, %v1036_v13 }
 0x69a   : > { %1497 = vmatmul.msk.bf16.vlgmr.msra.gmra.mxu0 %vm690_vm1, %v1037_v14 }
 0x717   : > { %v1070_v16 = vpop.f32.mrf.mxu0 }
 0x718   : > { %v1071_v61 = vadd.f32 %v1652_v15, %v1070_v16 }
 0x71a   : > { %v2100_v17 = vadd.f32 %v1071_v61, %v2014_v1  ;;  %v1552_v1 = vld [vmem:[%s1992_s18] sm:$0xff] }
 0x71b   : > { %1138 = vmatpush.bf16.msra.mxu1 %v1552_v1 }
 0x71c   : > { %v1075_v18 = vsel %vm690_vm1, %v2100_v17, 0.0 }
 0x71d   : > { %1076 = vadd.xlane.f32.xlu2 %v1075_v18 }
 0x71f   : > { %v1072_v19 = vpop.f32.mrf.mxu0 }
 0x790   : > { %v1077_v20 = vpop.xlane.xlu2 %1076 }
 0x791   : > { %v1078_v21 = vmul.f32 %v1077_v20, %v2018_v9 }
 0x793   : > { %v1079_v22 = vsub.f32 %v2100_v17, %v1078_v21 }
 0x795   : > { %v1080_v23 = vmul.f32 %v1079_v22, %v1079_v22 }
 0x797   : > { %v1081_v24 = vsel %vm690_vm1, %v1080_v23, 0.0 }
 0x798   : > { %1082 = vadd.xlane.f32.xlu0 %v1081_v24 }
 0x80b   : > { %v1083_v27 = vpop.xlane.xlu0 %1082 }
 0x80c   : > { %v1084_v28 = vmul.f32 %v1083_v27, %v2018_v9  ;;  %v1556_v9 = vld [vmem:[%s2006_s0 + $0x10] sm:$0xff] }
 0x80d   : > { %1219 = vmatpush.bf16.msrb.mxu3 %v1556_v9 }
 0x80e   : > { %v1085_v30 = vadd.f32 1e-05, %v1084_v28 }
 0x810   : > { %1682 = vrsqrt.f32 %v1085_v30  ;;  %vm1092_vm15 = vweird.f32 %v1085_v30 }
 0x811   : > { %1220 = vmatpush.bf16.msrb.mxu3 %v1555_v47 }
 0x815   : > { %1221 = vmatpush.bf16.msrb.mxu3 %v1554_v48 }
 0x816   : > { %v1683_v35 = vpop.eup %1682 }
 0x817   : > { %v1087_v34 = vmul.f32 %v1683_v35, %v1085_v30  ;;  %vm1093_vm14 = vweird.f32 %v1683_v35 }
 0x818   : > { %vm1094_vm0 = vmor %vm1092_vm15, %vm1093_vm14 }
 0x819   : > { %v1088_v37 = vmul.f32 %v1683_v35, %v1087_v34 }
 0x81b   : > { %v1089_v33 = vmul.f32 0.5, %v1088_v37 }
 0x81d   : > { %v1090_v38 = vsub.f32 1.5, %v1089_v33 }
 0x81f   : > { %v1091_v39 = vmul.f32 %v1683_v35, %v1090_v38 }
 0x821   : > { %v1095_v41 = vsel %vm1094_vm0, %v1683_v35, %v1091_v39 }
 0x822   : > { %v1096_v42 = vmul.f32 %v1095_v41, %v1079_v22 }
 0x824   : > { %v1101_v44 = vmul.f32 %v1653_v40, %v1096_v42 }
 0x826   : > { %v1106_v45 = vadd.f32 %v1654_v43, %v1101_v44 }
 0x828   : > { %v1107_v46 = vpack.c.bf16 %v1106_v45, %v1106_v45 }
 0x82a   : > { %1506 = vmatmul.msk.bf16.vlgmr.msra.gmra.mxu1 %vm690_vm1, %v1107_v46 }
 0x8a7   : > { %v1140_v50 = vpop.f32.mrf.mxu1 }
 0x8a8   : > { %v1141_v51 = vadd.f32 %v1655_v49, %v1140_v50 }
 0x8aa   : > { %v1144_v52 = vmax.f32 %v1141_v51, 0.0 }
 0x8ac   : > { %v1145_v53 = vpack.c.bf16 %v1144_v52, %v1144_v52 }
 0x8ae   : > { %1222 = vmatmul.bf16.vlgmr.msrb.gmra.mxu3 %v1145_v53 }
 0x8af   : > { %v1142_v54 = vpop.f32.mrf.mxu1 }
 0x931   : > { %v1223_v56 = vpop.f32.mrf.mxu3 }
 0x932   : > { %v1224_v57 = vadd.f32 %v1656_v55, %v1223_v56 }
 0x934   : > { %v1227_v59 = vmax.f32 %v1224_v57, 0.0 }
 0x936   : > { %v1232_v60 = vmul.f32 %v1657_v58, %v1227_v59  ;;  %1238 = sbr.rel (%p1539_p1) target bundleno = 2364 (0x93c), region = 84 }
 0x938   : > { %v1233_v62 = vadd.f32 %v1232_v60, %v2100_v17 }
 0x939   : > { %v1225_v63 = vpop.f32.mrf.mxu3 }
 0x93a   : > { %1234 = vst.msk [vmem:[#allocation2] sm:$0xff] %vm690_vm1, %v1233_v62 }
 0x93b   : > { %1239 = vst.msk [vmem:[%s629_s25] sm:$0xff] %vm690_vm1, %v1233_v62 }
 0x93c PF: > { %s2262_s29 = sld [smem:[#allocation10_spill]]  ;;  %s1253_s22 = sshll.u32 %s629_s25, 4  ;;  %s1254_s22 = int_to_ptr.vmem [resolvable:$true] %s1253_s22 }
 0x93d   : > { %s2263_s13 = sld [smem:[#allocation7_spill]] }
 0x93e   : > { %s2265_s18 = sld [smem:[#allocation24_spill]] }
 0x942   : > { %s1541_s2 = sshll.u32 %s2262_s29, 3 }
 0x943   : > { %s2267_s28 = sand.u32 1, %s2263_s13  }
 0x944   : > { %s2266_s5 = smov %s2265_s18  ;;  %s1251_s16 = scalar_lea.hbm %s2265_s18, %s1541_s2 }
 0x945   : > { %s1255_s27 = sshll.u32 %s1251_s16, 4  ;;  %s1241_s15 = scalar_lea.sflag [#allocation4], %s2267_s28  ;;  %s1256_s27 = int_to_ptr.hbm [resolvable:$true] %s1255_s27 }
 0x946   : > { %s1698_s21 = sshra.s32 %s1256_s27, 4  ;;  %s1704_s30 = scalar_lea.hbm %s2266_s5, 16  ;;  %s1699_s21 = int_to_ptr.hbm [resolvable:$true] %s1698_s21 }
 0x947   : > { %s1700_s14 = scalar_lea.hbm %s1699_s21, 8  ;;  %p1705_p6 = scmp.lt.s32.totalorder %s1699_s21, %s2266_s5 }
 0x948   : > { %p1701_p2 = scmp.ne.s32.totalorder %s1699_s21, %s1700_s14  ;;  %p1706_p7 = scmp.lt.s32.totalorder %s1704_s30, %s1700_s14 }
 0x94a   : > { %p1702_p4 = pnand %p1701_p2, %p1920_p3  ;;  %p1707_p8 = por %p1706_p7, %p1705_p6 }
 0x94c   : > { %p1703_p5 = pneg %p1702_p4 }
 0x94e   : > { %p1708_p10 = pnand %p1707_p8, %p1703_p5 }
 0x950   : > { %1711 = shalt.err (!%p1708_p10)
}
 0x951   : > { %1562 = dma.vmem_to_hbm [thread:$0]  (%p1920_p3), %s1254_s22, 128, %s1256_s27, %s1241_s15  }
 0x952 PF: > { %s2268_s23 = sld [smem:[#allocation13_spill]] }
 0x953   : > { %s2269_s25 = sld [smem:[#allocation6_spill]] }
 0x958   : > { %p1568_p11 = scmp.ge.s32.totalorder %s2268_s23, 2 }
 0x959   : > { %s1267_s13 = sand.u32 1, %s2269_s25  }
 0x95a   : > { %p1565_p12 = pnand %p1568_p11, %p1930_p9  ;;  %s1268_s2 = scalar_lea.sflag [#allocation4], %s1267_s13 }
 0x95c   : > { %p1566_p13 = pneg %p1565_p12 }
 0x95e   : > { %1745 = dma.done.wait (%p1566_p13), %s1268_s2, 128  }
 0x95f   : > { %1747 = vsyncadd (%p1566_p13), %s1268_s2, 4294967168  ;;  %s27_s20 = sadd.s32 1, %s2268_s23   ;;  %s2271_s29 = sld [smem:[#allocation7_spill]] }
 0x960   : > { %p24_p0 = scmp.ge.s32.totalorder %s27_s20, 6   ;;  %s2272_s30 = sld [smem:[#allocation8_spill]] }
 0x961   : > { %s2273_s15 = sld [smem:[#allocation18_spill]] }
 0x962   : > { %s2274_s16 = sld [smem:[#allocation11_spill]]  ;;  %26 = sbr.rel (!%p24_p0) target bundleno = 12 (0xc), region = 158 }
 0x963   : > { %s2275_s17 = sld [smem:[#allocation12_spill]] }
 0x964   : > { %s2276_s18 = sld [smem:[#allocation14_spill]] }
 0x965   : > { %s2277_s19 = sld [smem:[#allocation16_spill]] }
 0x967   :  { %1274 = vsyncpa [#allocation4], 1 }
 0x968   :  { %1276 = vsyncpa [#allocation4 + $0x1], 1 }

</bundles_post_ra>
